<compile_context>
chip_gen: v5e
topology: v5e:2x2
jax: 0.10.0
libtpu: 0.0.40
codegen_flags: <defaults>
</compile_context>

<pallas_src>
import functools

import jax
import jax.numpy as jnp
from jax.experimental import pallas as pl
from jax.experimental.pallas import tpu as pltpu

LN_EPS = 1e-5  # nn.LayerNorm default


# ---------------------------------------------------------------- in-kernel helpers
def _gelu_tanh(x):
    # tanh-form GELU: tanh runs on the EUP (its own VLIW slot), ~6 VALU ops/elem vs ~12
    # for the erf polynomial.  Max abs deviation from exact-erf GELU ~3e-4.
    c = 0.7978845608028654  # sqrt(2/pi)
    return 0.5 * x * (1.0 + jnp.tanh(c * (x + 0.044715 * x * x * x)))


def _layernorm(x, g, b):
    mu = jnp.mean(x, axis=-1, keepdims=True)
    var = jnp.mean(jnp.square(x - mu), axis=-1, keepdims=True)
    return (x - mu) * jax.lax.rsqrt(var + LN_EPS) * g + b


# ---------------------------------------------------------------- fused layer kernel
def _encoder_layer_kernel(x_ref, mb_ref,
                          ln1g_ref, ln1b_ref,
                          w_in_ref, b_in_ref, wo_ref, bo_ref,
                          ln2g_ref, ln2b_ref,
                          w1_ref, b1_ref, w2_ref, b2_ref,
                          ln3g_ref, ln3b_ref,
                          o_ref,
                          qc_ref, kc_ref, vc_ref,
                          *, num_heads, apply_final_ln, exp_dtype):
    TQ, E = o_ref.shape            # query-tile rows, embedding
    S = x_ref.shape[0]             # full sequence (keys / values)
    H = num_heads
    dh = E // H
    cd = w_in_ref.dtype            # matmul operand dtype (f32 or bf16)

    qi = pl.program_id(1)
    row0 = pl.multiple_of(qi * TQ, TQ)

    # ---- once per batch element: LayerNorm + fused QKV projection into VMEM caches ------
    @pl.when(qi == 0)
    def _():
        xn = _layernorm(x_ref[...].astype(jnp.float32), ln1g_ref[...], ln1b_ref[...])
        qkv = jnp.dot(xn.astype(cd), w_in_ref[...],
                      preferred_element_type=jnp.float32) + b_in_ref[...]      # (S, 3E)
        qc_ref[...] = qkv[:, :E].astype(cd)            # Q (pre-scaled by 1/sqrt(dh))
        kc_ref[...] = qkv[:, E:2 * E].astype(cd)       # K
        vc_ref[...] = qkv[:, 2 * E:].astype(cd)        # V

    x_q = x_ref[pl.ds(row0, TQ), :].astype(jnp.float32)       # residual rows (TQ, E)
    mb = mb_ref[...]                                           # (1, S) additive key bias

    # ---- multi-head self-attention (heads batched on the MXU) ---------------------------
    # NOTE: check pl.lower_as_mlir for relayouts around these reshapes/einsums; if Mosaic
    # inserts per-contraction transposes, switch the caches to head-major (H, S, dh).
    # TODO(synk): flash-style K/V streaming (third "arbitrary" grid axis over S-chunks with
    # an online-softmax running max/denominator) so scores become (H, TQ, TK) for very long
    # S on v7x, where the full (H, TQ, S) f32 score tensor approaches the 64 MiB VMEM.
    q3 = qc_ref[pl.ds(row0, TQ), :].reshape(TQ, H, dh)
    k3 = kc_ref[...].reshape(S, H, dh)
    v3 = vc_ref[...].reshape(S, H, dh)

    scores = jnp.einsum("qhd,khd->hqk", q3, k3,
                        preferred_element_type=jnp.float32)                    # (H, TQ, S)
    scores = scores + mb                               # key-padding bias (broadcast over H,TQ)
    m = jnp.max(scores, axis=-1, keepdims=True)
    # Fully-masked rows yield a uniform softmax (mean of V) instead of PyTorch's NaNs.
    p = jnp.exp((scores - m).astype(exp_dtype))        # bf16 exp on v6e/v7x bf16 path
    denom = jnp.sum(p, axis=-1, keepdims=True, dtype=jnp.float32)              # (H, TQ, 1)
    inv = pl.reciprocal(denom, approx=True)            # EUP slot, not the VALU
    inv = inv * (2.0 - denom * inv)                    # one Newton step on the narrow tensor
    ctx = jnp.einsum("hqk,khd->qhd", p.astype(cd), v3,
                     preferred_element_type=jnp.float32)                       # (TQ, H, dh)
    inv_t = inv.reshape(H, TQ).T.reshape(TQ, H, 1)     # small 2-D transpose (XLU)
    ctx = ctx * inv_t                                  # deferred softmax normalization
    attn = jnp.dot(ctx.reshape(TQ, E).astype(cd), wo_ref[...],
                   preferred_element_type=jnp.float32) + bo_ref[...]
    x1 = x_q + attn                                    # residual (dropout = identity)

    # ---- pre-norm + MLP ------------------------------------------------------------------
    xn2 = _layernorm(x1, ln2g_ref[...], ln2b_ref[...])
    h1 = jnp.dot(xn2.astype(cd), w1_ref[...],
                 preferred_element_type=jnp.float32) + b1_ref[...]
    h1 = _gelu_tanh(h1)
    h2 = jnp.dot(h1.astype(cd), w2_ref[...],
                 preferred_element_type=jnp.float32) + b2_ref[...]
    out = x1 + h2

    if apply_final_ln:                                 # static: fuse the stack's final LN
        out = _layernorm(out, ln3g_ref[...], ln3b_ref[...])

    o_ref[...] = out.astype(o_ref.dtype)


# ---------------------------------------------------------------- generation / VMEM helpers
def _tpu_generation():
    """(wide_mxu, bf16_eup): v6e/v7x and later -> True, v5e and earlier -> False."""
    try:
        kind = jax.devices()[0].device_kind.lower()
    except Exception:
        kind = ""
    old = any(tag in kind for tag in ("v2", "v3", "v4", "v5"))
    return (not old), (not old)


def _vmem_capacity_bytes():
    try:
        return int(pltpu.get_tpu_info().vmem_capacity_bytes)
    except Exception:
        return 64 * 1024 * 1024      # conservative fallback (v7x per-TC capacity)


def _vmem_estimate(S, E, H, TQ, d_ff, act_bytes, w_bytes, exp_bytes, weight_bufs):
    x_blocks = 2 * S * E * act_bytes                       # per-batch x, double-buffered
    mb_blocks = 2 * S * 4
    out_blocks = 2 * TQ * E * act_bytes                    # double-buffered output block
    weight_blocks = weight_bufs * (
        (3 * E * E + E * E + E * d_ff + d_ff * E) * w_bytes   # matmul weights
        + (3 * E + E + d_ff + E) * 4                           # biases (f32)
        + 6 * E * 4)                                           # LayerNorm params (f32)
    caches = 3 * S * E * w_bytes                           # persistent Q/K/V VMEM caches
    fill = (S * E + 3 * S * E) * 4                         # xn + fused QKV (f32) at fill step
    step = (H * TQ * S * (4 + exp_bytes)                   # scores (f32) + p
            + TQ * d_ff * 4                                # FFN intermediate
            + 8 * TQ * E * 4)                              # ctx / residual / LN temporaries
    return (x_blocks + mb_blocks + out_blocks + weight_blocks
            + caches + fill + step + (2 << 20))


def _pick_query_tile(S, prefer, fits):
    cands = [t for t in (256, 128, 64, 32, 16, 8) if t <= prefer]
    for t in cands:                       # largest tile that divides S and fits VMEM
        if S % t == 0 and fits(t):
            return t
    for t in cands:                       # largest tile that at least divides S
        if S % t == 0:
            return t
    return S                              # no candidate divides S: one full-sequence tile


def _const_spec_factory():
    """Grid-invariant blocks: single-buffer (pipeline_mode=pl.Buffered(1)) when supported."""
    if hasattr(pl, "Buffered"):
        try:
            pl.BlockSpec((8, 128), lambda *_: (0, 0), pipeline_mode=pl.Buffered(1))
            return (lambda shape: pl.BlockSpec(shape, lambda *_: (0,) * len(shape),
                                               pipeline_mode=pl.Buffered(1))), 1
        except TypeError:
            pass
    return (lambda shape: pl.BlockSpec(shape, lambda *_: (0,) * len(shape))), 2


_CONST_SPEC, _WEIGHT_BUFFERS = _const_spec_factory()


# ---------------------------------------------------------------- wrapper
def encoder_layer_forward(seq, mask, params, num_heads, *, compute_dtype=jnp.float32):
    B, S, E = seq.shape
    H = num_heads
    assert E % H == 0, "embedding_size must be divisible by num_heads"
    dh = E // H
    d_ff = 4 * E
    num_layers = len(params["layers"])
    assert num_layers >= 1

    wide_mxu, bf16_eup = _tpu_generation()
    budget = int(0.9 * _vmem_capacity_bytes())

    act_bytes = jnp.dtype(seq.dtype).itemsize
    w_bytes = jnp.dtype(compute_dtype).itemsize
    use_bf16_exp = (jnp.dtype(compute_dtype) == jnp.dtype(jnp.bfloat16)) and bf16_eup
    exp_dtype = jnp.bfloat16 if use_bf16_exp else jnp.float32
    exp_bytes = jnp.dtype(exp_dtype).itemsize

    def est(tq):
        return _vmem_estimate(S, E, H, tq, d_ff, act_bytes, w_bytes, exp_bytes,
                              _WEIGHT_BUFFERS)

    prefer_tq = 256 if wide_mxu else 128          # match the 256-wide v6e/v7x MXU
    TQ = _pick_query_tile(S, prefer_tq, lambda t: est(t) <= budget)
    NQ = S // TQ
    vmem_limit = int(min(max(32 * 1024 * 1024, est(TQ)), budget))

    x = seq
    mb = jnp.where(mask, -1e30, 0.0).astype(jnp.float32).reshape(B, 1, S)

    # One-time weight transforms in plain JAX: fold 1/sqrt(dh) into the Q columns of the
    # fused in-projection, cast matmul weights to compute_dtype (biases / LN stay f32;
    # on v5e keep elementwise math f32 — only MXU operands are bf16).
    scale = 1.0 / (dh ** 0.5)
    qkv_scale = jnp.concatenate([jnp.full((1, E), scale, jnp.float32),
                                 jnp.ones((1, 2 * E), jnp.float32)], axis=-1)
    layers = []
    for lp in params["layers"]:
        layers.append(dict(
            ln1_g=lp["ln1_g"], ln1_b=lp["ln1_b"],
            w_in=(lp["w_in"] * qkv_scale).astype(compute_dtype),
            b_in=lp["b_in"] * qkv_scale,
            w_o=lp["w_o"].astype(compute_dtype), b_o=lp["b_o"],
            ln2_g=lp["ln2_g"], ln2_b=lp["ln2_b"],
            w1=lp["w1"].astype(compute_dtype), b1=lp["b1"],
            w2=lp["w2"].astype(compute_dtype), b2=lp["b2"],
        ))

    in_specs = [
        pl.BlockSpec((None, S, E), lambda b, qi: (b, 0, 0)),    # x: full sequence per batch
        pl.BlockSpec((None, 1, S), lambda b, qi: (b, 0, 0)),    # additive key-padding bias
        _CONST_SPEC((1, E)), _CONST_SPEC((1, E)),               # ln1 gamma / beta
        _CONST_SPEC((E, 3 * E)), _CONST_SPEC((1, 3 * E)),       # fused W_in / b_in (Q scaled)
        _CONST_SPEC((E, E)), _CONST_SPEC((1, E)),               # W_o / b_o
        _CONST_SPEC((1, E)), _CONST_SPEC((1, E)),               # ln2 gamma / beta
        _CONST_SPEC((E, d_ff)), _CONST_SPEC((1, d_ff)),         # mlp W1 / b1
        _CONST_SPEC((d_ff, E)), _CONST_SPEC((1, E)),            # mlp W2 / b2
        _CONST_SPEC((1, E)), _CONST_SPEC((1, E)),               # final ln gamma / beta
    ]
    out_spec = pl.BlockSpec((None, TQ, E), lambda b, qi: (b, qi, 0))
    scratch = [pltpu.VMEM((S, E), compute_dtype),               # Q cache (pre-scaled)
               pltpu.VMEM((S, E), compute_dtype),               # K cache
               pltpu.VMEM((S, E), compute_dtype)]               # V cache

    # B stays the leading "parallel" axis so v7x's two TensorCores split the batch; the
    # query-tile axis is "arbitrary" because the QKV caches carry state across qi.
    # TODO(synk): when B == 1 on v7x, add an explicit leading core-parallel split of the
    # qi range (each core filling its own cache) so both TensorCores stay busy.
    def build(apply_final_ln):
        return pl.pallas_call(
            functools.partial(_encoder_layer_kernel, num_heads=H,
                              apply_final_ln=apply_final_ln, exp_dtype=exp_dtype),
            out_shape=jax.ShapeDtypeStruct((B, S, E), x.dtype),
            grid=(B, NQ),
            in_specs=in_specs,
            out_specs=out_spec,
            scratch_shapes=scratch,
            compiler_params=pltpu.CompilerParams(
                dimension_semantics=("parallel", "arbitrary"),
                vmem_limit_bytes=vmem_limit),
        )

    layer_call = build(False)
    last_call = build(True)      # final LayerNorm fused into the last layer

    ln3_g, ln3_b = params["ln3_g"], params["ln3_b"]
    for i, lp in enumerate(layers):
        call = last_call if i == num_layers - 1 else layer_call
        x = call(x, mb,
                 lp["ln1_g"], lp["ln1_b"],
                 lp["w_in"], lp["b_in"],
                 lp["w_o"], lp["b_o"],
                 lp["ln2_g"], lp["ln2_b"],
                 lp["w1"], lp["b1"], lp["w2"], lp["b2"],
                 ln3_g, ln3_b)
    return x


# ---------------------------------------------------------------- deterministic params
def init_params(key, num_layers, E):
    d_ff = 4 * E

    def dense(k, fan_in, shape):
        return jax.random.normal(k, shape, jnp.float32) / jnp.sqrt(jnp.float32(fan_in))

    layers = []
    for i in range(num_layers):
        ks = jax.random.split(jax.random.fold_in(key, i), 8)
        layers.append(dict(
            ln1_g=jnp.ones((1, E), jnp.float32), ln1_b=jnp.zeros((1, E), jnp.float32),
            w_in=dense(ks[0], E, (E, 3 * E)),
            b_in=0.01 * jax.random.normal(ks[1], (1, 3 * E), jnp.float32),
            w_o=dense(ks[2], E, (E, E)),
            b_o=0.01 * jax.random.normal(ks[3], (1, E), jnp.float32),
            ln2_g=jnp.ones((1, E), jnp.float32), ln2_b=jnp.zeros((1, E), jnp.float32),
            w1=dense(ks[4], E, (E, d_ff)),
            b1=0.01 * jax.random.normal(ks[5], (1, d_ff), jnp.float32),
            w2=dense(ks[6], d_ff, (d_ff, E)),
            b2=0.01 * jax.random.normal(ks[7], (1, E), jnp.float32),
        ))
    return dict(layers=layers,
                ln3_g=jnp.ones((1, E), jnp.float32),
                ln3_b=jnp.zeros((1, E), jnp.float32))


# ---------------------------------------------------------------- pure-JAX reference
def reference_forward(seq, mask, params, num_heads):
    B, S, E = seq.shape
    dh = E // num_heads
    mb = jnp.where(mask, -1e30, 0.0)[:, None, None, :]   # (B,1,1,S)

    def ln(x, g, b):
        mu = x.mean(-1, keepdims=True)
        var = ((x - mu) ** 2).mean(-1, keepdims=True)
        return (x - mu) * jax.lax.rsqrt(var + LN_EPS) * g + b

    x = seq
    for lp in params["layers"]:
        xn = ln(x, lp["ln1_g"][0], lp["ln1_b"][0])
        qkv = xn @ lp["w_in"] + lp["b_in"][0]
        q, k, v = jnp.split(qkv, 3, axis=-1)
        heads = lambda t: t.reshape(B, S, num_heads, dh).transpose(0, 2, 1, 3)
        qh, kh, vh = heads(q), heads(k), heads(v)
        scores = jnp.einsum("bhqd,bhkd->bhqk", qh, kh) / jnp.sqrt(1.0 * dh) + mb
        p = jax.nn.softmax(scores, axis=-1)
        o = jnp.einsum("bhqk,bhkd->bhqd", p, vh).transpose(0, 2, 1, 3).reshape(B, S, E)
        x = x + (o @ lp["w_o"] + lp["b_o"][0])
        xn = ln(x, lp["ln2_g"][0], lp["ln2_b"][0])
        h1 = jax.nn.gelu(xn @ lp["w1"] + lp["b1"][0], approximate=False)
        x = x + (h1 @ lp["w2"] + lp["b2"][0])
    return ln(x, params["ln3_g"][0], params["ln3_b"][0])


if __name__ == "__main__":
    num_layers, embedding_size, num_heads = 2, 32, 4
    B, S = 2, 8
    key = jax.random.PRNGKey(0)
    kp, kx = jax.random.split(key)
    params = init_params(kp, num_layers, embedding_size)
    seq = jax.random.normal(kx, (B, S, embedding_size), jnp.float32)
    # key_padding_mask: True = ignore this key position (last 2 tokens of batch 0 padded)
    mask = jnp.array([[False] * 6 + [True] * 2,
                      [False] * 8], dtype=bool)

    # f32 path: tight check against the exact-erf / exact-softmax reference.  Tolerance
    # covers the documented in-kernel approximations (tanh-GELU ~3e-4/elem, EUP reciprocal
    # with one Newton refinement ~1e-7 rel).
    out = encoder_layer_forward(seq, mask, params, num_heads)
    out = jax.block_until_ready(out)
    ref = reference_forward(seq, mask, params, num_heads)
    max_err = float(jnp.max(jnp.abs(out - ref)))
    assert jnp.allclose(out, ref, atol=2e-3, rtol=2e-3), f"f32 max abs err = {max_err}"

    # bf16 weights + bf16 residual-stream smoke test (halves HBM / weight VMEM traffic;
    # LayerNorm, softmax reductions and matmul accumulation stay f32 inside the kernel;
    # on v6e/v7x the softmax exp also runs in bf16).
    out_bf16 = encoder_layer_forward(seq.astype(jnp.bfloat16), mask, params, num_heads,
                                     compute_dtype=jnp.bfloat16)
    out_bf16 = jax.block_until_ready(out_bf16).astype(jnp.float32)
    bf16_err = float(jnp.max(jnp.abs(out_bf16 - ref)))
    assert bool(jnp.all(jnp.isfinite(out_bf16))) and bf16_err < 0.25, \
        f"bf16 max abs err = {bf16_err}"

    print("KERNEL_OK")
</pallas_src>

<mosaic_0001>
module attributes {stable_mosaic.version = 11 : i64} {
  func.func @_encoder_layer_kernel(%arg0: i32, %arg1: i32, %arg2: memref<1x8x32xf32, #tpu.memory_space<vmem>>, %arg3: memref<1x1x8xf32, #tpu.memory_space<vmem>>, %arg4: memref<1x32xf32, #tpu.memory_space<vmem>>, %arg5: memref<1x32xf32, #tpu.memory_space<vmem>>, %arg6: memref<32x96xf32, #tpu.memory_space<vmem>>, %arg7: memref<1x96xf32, #tpu.memory_space<vmem>>, %arg8: memref<32x32xf32, #tpu.memory_space<vmem>>, %arg9: memref<1x32xf32, #tpu.memory_space<vmem>>, %arg10: memref<1x32xf32, #tpu.memory_space<vmem>>, %arg11: memref<1x32xf32, #tpu.memory_space<vmem>>, %arg12: memref<32x128xf32, #tpu.memory_space<vmem>>, %arg13: memref<1x128xf32, #tpu.memory_space<vmem>>, %arg14: memref<128x32xf32, #tpu.memory_space<vmem>>, %arg15: memref<1x32xf32, #tpu.memory_space<vmem>>, %arg16: memref<1x32xf32, #tpu.memory_space<vmem>>, %arg17: memref<1x32xf32, #tpu.memory_space<vmem>>, %arg18: memref<1x8x32xf32, #tpu.memory_space<vmem>>, %arg19: memref<8x32xf32, #tpu.memory_space<vmem>>, %arg20: memref<8x32xf32, #tpu.memory_space<vmem>>, %arg21: memref<8x32xf32, #tpu.memory_space<vmem>>) attributes {dimension_semantics = [#tpu.dimension_semantics<parallel>, #tpu.dimension_semantics<arbitrary>], iteration_bounds = array<i64: 2, 1>, scalar_prefetch = 0 : i64, scratch_operands = 3 : i64, tpu.core_type = #tpu.core_type<tc>, window_params = [{transform_indices = @transform_0, window_bounds = array<i64: 1, 8, 32>}, {transform_indices = @transform_1, window_bounds = array<i64: 1, 1, 8>}, {pipeline_mode = #tpu.pipeline_mode<synchronous>, transform_indices = @transform_2, window_bounds = array<i64: 1, 32>}, {pipeline_mode = #tpu.pipeline_mode<synchronous>, transform_indices = @transform_3, window_bounds = array<i64: 1, 32>}, {pipeline_mode = #tpu.pipeline_mode<synchronous>, transform_indices = @transform_4, window_bounds = array<i64: 32, 96>}, {pipeline_mode = #tpu.pipeline_mode<synchronous>, transform_indices = @transform_5, window_bounds = array<i64: 1, 96>}, {pipeline_mode = #tpu.pipeline_mode<synchronous>, transform_indices = @transform_6, window_bounds = array<i64: 32, 32>}, {pipeline_mode = #tpu.pipeline_mode<synchronous>, transform_indices = @transform_7, window_bounds = array<i64: 1, 32>}, {pipeline_mode = #tpu.pipeline_mode<synchronous>, transform_indices = @transform_8, window_bounds = array<i64: 1, 32>}, {pipeline_mode = #tpu.pipeline_mode<synchronous>, transform_indices = @transform_9, window_bounds = array<i64: 1, 32>}, {pipeline_mode = #tpu.pipeline_mode<synchronous>, transform_indices = @transform_10, window_bounds = array<i64: 32, 128>}, {pipeline_mode = #tpu.pipeline_mode<synchronous>, transform_indices = @transform_11, window_bounds = array<i64: 1, 128>}, {pipeline_mode = #tpu.pipeline_mode<synchronous>, transform_indices = @transform_12, window_bounds = array<i64: 128, 32>}, {pipeline_mode = #tpu.pipeline_mode<synchronous>, transform_indices = @transform_13, window_bounds = array<i64: 1, 32>}, {pipeline_mode = #tpu.pipeline_mode<synchronous>, transform_indices = @transform_14, window_bounds = array<i64: 1, 32>}, {pipeline_mode = #tpu.pipeline_mode<synchronous>, transform_indices = @transform_15, window_bounds = array<i64: 1, 32>}, {transform_indices = @transform_16, window_bounds = array<i64: 1, 8, 32>}]} {
    %c8_i32 = arith.constant 8 : i32
    %0 = arith.muli %arg1, %c8_i32 : i32
    %1 = tpu.assume_multiple %0, 8 : i32
    %c0_i32 = arith.constant 0 : i32
    %2 = arith.cmpi eq, %arg1, %c0_i32 : i32
    %3 = arith.extui %2 : i1 to i32
    %c0_i32_0 = arith.constant 0 : i32
    %4 = arith.cmpi ne, %3, %c0_i32_0 : i32
    scf.if %4 {
      %c0_45 = arith.constant 0 : index
      %c0_46 = arith.constant 0 : index
      %c0_47 = arith.constant 0 : index
      %98 = vector.load %arg2[%c0_45, %c0_46, %c0_47] : memref<1x8x32xf32, #tpu.memory_space<vmem>>, vector<1x8x32xf32>
      %99 = vector.shape_cast %98 : vector<1x8x32xf32> to vector<8x32xf32>
      %c0_48 = arith.constant 0 : index
      %c0_49 = arith.constant 0 : index
      %100 = vector.load %arg4[%c0_48, %c0_49] : memref<1x32xf32, #tpu.memory_space<vmem>>, vector<1x32xf32>
      %c0_50 = arith.constant 0 : index
      %c0_51 = arith.constant 0 : index
      %101 = vector.load %arg5[%c0_50, %c0_51] : memref<1x32xf32, #tpu.memory_space<vmem>>, vector<1x32xf32>
      %cst_52 = arith.constant dense<0.000000e+00> : vector<8xf32>
      %102 = vector.multi_reduction <add>, %99, %cst_52 [1] : vector<8x32xf32> to vector<8xf32>
      %103 = vector.shape_cast %102 : vector<8xf32> to vector<8x1xf32>
      %cst_53 = arith.constant 3.200000e+01 : f32
      %104 = vector.broadcast %cst_53 : f32 to vector<8x1xf32>
      %105 = arith.divf %103, %104 : vector<8x1xf32>
      %106 = vector.broadcast %105 : vector<8x1xf32> to vector<8x32xf32>
      %107 = arith.subf %99, %106 : vector<8x32xf32>
      %108 = arith.mulf %107, %107 : vector<8x32xf32>
      %cst_54 = arith.constant dense<0.000000e+00> : vector<8xf32>
      %109 = vector.multi_reduction <add>, %108, %cst_54 [1] : vector<8x32xf32> to vector<8xf32>
      %110 = vector.shape_cast %109 : vector<8xf32> to vector<8x1xf32>
      %cst_55 = arith.constant 3.200000e+01 : f32
      %111 = vector.broadcast %cst_55 : f32 to vector<8x1xf32>
      %112 = arith.divf %110, %111 : vector<8x1xf32>
      %113 = vector.broadcast %105 : vector<8x1xf32> to vector<8x32xf32>
      %114 = arith.subf %99, %113 : vector<8x32xf32>
      %cst_56 = arith.constant 9.99999974E-6 : f32
      %115 = vector.broadcast %cst_56 : f32 to vector<8x1xf32>
      %116 = arith.addf %112, %115 : vector<8x1xf32>
      %117 = math.rsqrt %116 : vector<8x1xf32>
      %118 = vector.broadcast %117 : vector<8x1xf32> to vector<8x32xf32>
      %119 = arith.mulf %114, %118 : vector<8x32xf32>
      %120 = vector.broadcast %100 : vector<1x32xf32> to vector<8x32xf32>
      %121 = arith.mulf %119, %120 : vector<8x32xf32>
      %122 = vector.broadcast %101 : vector<1x32xf32> to vector<8x32xf32>
      %123 = arith.addf %121, %122 : vector<8x32xf32>
      %c0_57 = arith.constant 0 : index
      %c0_58 = arith.constant 0 : index
      %124 = vector.load %arg6[%c0_57, %c0_58] : memref<32x96xf32, #tpu.memory_space<vmem>>, vector<32x96xf32>
      %cst_59 = arith.constant dense<0.000000e+00> : vector<8x96xf32>
      %125 = tpu.matmul %123, %124, %cst_59 {dimension_numbers = #tpu.dot_dimension_numbers<[1], [0], [0], [1], [0, 0, 1, 1], [], []>} : vector<8x32xf32>, vector<32x96xf32>, vector<8x96xf32> -> vector<8x96xf32>
      %c0_60 = arith.constant 0 : index
      %c0_61 = arith.constant 0 : index
      %126 = vector.load %arg7[%c0_60, %c0_61] : memref<1x96xf32, #tpu.memory_space<vmem>>, vector<1x96xf32>
      %127 = vector.broadcast %126 : vector<1x96xf32> to vector<8x96xf32>
      %128 = arith.addf %125, %127 : vector<8x96xf32>
      %129 = vector.extract_strided_slice %128 {offsets = [0, 0], sizes = [8, 32], strides = [1, 1]} : vector<8x96xf32> to vector<8x32xf32>
      %c0_62 = arith.constant 0 : index
      %c0_63 = arith.constant 0 : index
      %130 = vector.load %arg19[%c0_62, %c0_63] : memref<8x32xf32, #tpu.memory_space<vmem>>, vector<8x32xf32>
      tpu.vector_store %arg19[%c0_62, %c0_63], %129 {strides = array<i32>} : memref<8x32xf32, #tpu.memory_space<vmem>>, vector<8x32xf32>,
      %131 = vector.extract_strided_slice %128 {offsets = [0, 32], sizes = [8, 32], strides = [1, 1]} : vector<8x96xf32> to vector<8x32xf32>
      %c0_64 = arith.constant 0 : index
      %c0_65 = arith.constant 0 : index
      %132 = vector.load %arg20[%c0_64, %c0_65] : memref<8x32xf32, #tpu.memory_space<vmem>>, vector<8x32xf32>
      tpu.vector_store %arg20[%c0_64, %c0_65], %131 {strides = array<i32>} : memref<8x32xf32, #tpu.memory_space<vmem>>, vector<8x32xf32>,
      %133 = vector.extract_strided_slice %128 {offsets = [0, 64], sizes = [8, 32], strides = [1, 1]} : vector<8x96xf32> to vector<8x32xf32>
      %c0_66 = arith.constant 0 : index
      %c0_67 = arith.constant 0 : index
      %134 = vector.load %arg21[%c0_66, %c0_67] : memref<8x32xf32, #tpu.memory_space<vmem>>, vector<8x32xf32>
      tpu.vector_store %arg21[%c0_66, %c0_67], %133 {strides = array<i32>} : memref<8x32xf32, #tpu.memory_space<vmem>>, vector<8x32xf32>,
    } else {
    }
    %c0 = arith.constant 0 : index
    %5 = arith.index_cast %1 : i32 to index
    %c0_1 = arith.constant 0 : index
    %6 = vector.load %arg2[%c0, %5, %c0_1] : memref<1x8x32xf32, #tpu.memory_space<vmem>>, vector<1x8x32xf32>
    %7 = vector.shape_cast %6 : vector<1x8x32xf32> to vector<8x32xf32>
    %c0_2 = arith.constant 0 : index
    %c0_3 = arith.constant 0 : index
    %c0_4 = arith.constant 0 : index
    %8 = vector.load %arg3[%c0_2, %c0_3, %c0_4] : memref<1x1x8xf32, #tpu.memory_space<vmem>>, vector<1x1x8xf32>
    %9 = vector.shape_cast %8 : vector<1x1x8xf32> to vector<1x8xf32>
    %10 = arith.index_cast %1 : i32 to index
    %c0_5 = arith.constant 0 : index
    %11 = vector.load %arg19[%10, %c0_5] : memref<8x32xf32, #tpu.memory_space<vmem>>, vector<8x32xf32>
    %12 = vector.shape_cast %11 : vector<8x32xf32> to vector<8x4x8xf32>
    %c0_6 = arith.constant 0 : index
    %c0_7 = arith.constant 0 : index
    %13 = vector.load %arg20[%c0_6, %c0_7] : memref<8x32xf32, #tpu.memory_space<vmem>>, vector<8x32xf32>
    %14 = vector.shape_cast %13 : vector<8x32xf32> to vector<8x4x8xf32>
    %c0_8 = arith.constant 0 : index
    %c0_9 = arith.constant 0 : index
    %15 = vector.load %arg21[%c0_8, %c0_9] : memref<8x32xf32, #tpu.memory_space<vmem>>, vector<8x32xf32>
    %16 = vector.shape_cast %15 : vector<8x32xf32> to vector<8x4x8xf32>
    "tpu.trace_start"() <{level = 10 : i32, message = "qhd,khd->hqk"}> : () -> ()
    %cst = arith.constant dense<0.000000e+00> : vector<4x8x8xf32>
    %17 = tpu.matmul %12, %14, %cst {dimension_numbers = #tpu.dot_dimension_numbers<[2], [2], [0], [0], [0, 1, 0, 0, 1, 0], [1], [1]>} : vector<8x4x8xf32>, vector<8x4x8xf32>, vector<4x8x8xf32> -> vector<4x8x8xf32>
    "tpu.trace_stop"() : () -> ()
    %18 = vector.shape_cast %9 : vector<1x8xf32> to vector<1x1x8xf32>
    %19 = vector.broadcast %18 : vector<1x1x8xf32> to vector<4x8x8xf32>
    %20 = arith.addf %17, %19 : vector<4x8x8xf32>
    %cst_10 = arith.constant dense<0xFF800000> : vector<4x8xf32>
    %21 = vector.multi_reduction <maximumf>, %20, %cst_10 [2] : vector<4x8x8xf32> to vector<4x8xf32>
    %22 = vector.shape_cast %21 : vector<4x8xf32> to vector<4x8x1xf32>
    %23 = vector.broadcast %22 : vector<4x8x1xf32> to vector<4x8x8xf32>
    %24 = arith.subf %20, %23 : vector<4x8x8xf32>
    %25 = math.exp %24 : vector<4x8x8xf32>
    %cst_11 = arith.constant dense<0.000000e+00> : vector<4x8xf32>
    %26 = vector.multi_reduction <add>, %25, %cst_11 [2] : vector<4x8x8xf32> to vector<4x8xf32>
    %27 = vector.shape_cast %26 : vector<4x8xf32> to vector<4x8x1xf32>
    %28 = tpu.reciprocal %27 {approx = true} : vector<4x8x1xf32> -> vector<4x8x1xf32>
    %29 = arith.mulf %27, %28 : vector<4x8x1xf32>
    %cst_12 = arith.constant 2.000000e+00 : f32
    %30 = vector.broadcast %cst_12 : f32 to vector<4x8x1xf32>
    %31 = arith.subf %30, %29 : vector<4x8x1xf32>
    %32 = arith.mulf %28, %31 : vector<4x8x1xf32>
    "tpu.trace_start"() <{level = 10 : i32, message = "hqk,khd->qhd"}> : () -> ()
    %cst_13 = arith.constant dense<0.000000e+00> : vector<4x8x8xf32>
    %33 = tpu.matmul %16, %25, %cst_13 {dimension_numbers = #tpu.dot_dimension_numbers<[0], [2], [2], [1], [0, 1, 0, 2, 1, 1], [1], [0]>} : vector<8x4x8xf32>, vector<4x8x8xf32>, vector<4x8x8xf32> -> vector<4x8x8xf32>
    %34 = tpu.transpose %33, [2, 0, 1] : vector<4x8x8xf32> -> vector<8x4x8xf32>
    "tpu.trace_stop"() : () -> ()
    %35 = vector.shape_cast %32 : vector<4x8x1xf32> to vector<4x8xf32>
    %36 = tpu.transpose %35, [1, 0] : vector<4x8xf32> -> vector<8x4xf32>
    %37 = vector.shape_cast %36 : vector<8x4xf32> to vector<8x4x1xf32>
    %38 = vector.broadcast %37 : vector<8x4x1xf32> to vector<8x4x8xf32>
    %39 = arith.mulf %34, %38 : vector<8x4x8xf32>
    %40 = vector.shape_cast %39 : vector<8x4x8xf32> to vector<8x32xf32>
    %c0_14 = arith.constant 0 : index
    %c0_15 = arith.constant 0 : index
    %41 = vector.load %arg8[%c0_14, %c0_15] : memref<32x32xf32, #tpu.memory_space<vmem>>, vector<32x32xf32>
    %cst_16 = arith.constant dense<0.000000e+00> : vector<8x32xf32>
    %42 = tpu.matmul %40, %41, %cst_16 {dimension_numbers = #tpu.dot_dimension_numbers<[1], [0], [0], [1], [0, 0, 1, 1], [], []>} : vector<8x32xf32>, vector<32x32xf32>, vector<8x32xf32> -> vector<8x32xf32>
    %c0_17 = arith.constant 0 : index
    %c0_18 = arith.constant 0 : index
    %43 = vector.load %arg9[%c0_17, %c0_18] : memref<1x32xf32, #tpu.memory_space<vmem>>, vector<1x32xf32>
    %44 = vector.broadcast %43 : vector<1x32xf32> to vector<8x32xf32>
    %45 = arith.addf %42, %44 : vector<8x32xf32>
    %46 = arith.addf %7, %45 : vector<8x32xf32>
    %c0_19 = arith.constant 0 : index
    %c0_20 = arith.constant 0 : index
    %47 = vector.load %arg10[%c0_19, %c0_20] : memref<1x32xf32, #tpu.memory_space<vmem>>, vector<1x32xf32>
    %c0_21 = arith.constant 0 : index
    %c0_22 = arith.constant 0 : index
    %48 = vector.load %arg11[%c0_21, %c0_22] : memref<1x32xf32, #tpu.memory_space<vmem>>, vector<1x32xf32>
    %cst_23 = arith.constant dense<0.000000e+00> : vector<8xf32>
    %49 = vector.multi_reduction <add>, %46, %cst_23 [1] : vector<8x32xf32> to vector<8xf32>
    %50 = vector.shape_cast %49 : vector<8xf32> to vector<8x1xf32>
    %cst_24 = arith.constant 3.200000e+01 : f32
    %51 = vector.broadcast %cst_24 : f32 to vector<8x1xf32>
    %52 = arith.divf %50, %51 : vector<8x1xf32>
    %53 = vector.broadcast %52 : vector<8x1xf32> to vector<8x32xf32>
    %54 = arith.subf %46, %53 : vector<8x32xf32>
    %55 = arith.mulf %54, %54 : vector<8x32xf32>
    %cst_25 = arith.constant dense<0.000000e+00> : vector<8xf32>
    %56 = vector.multi_reduction <add>, %55, %cst_25 [1] : vector<8x32xf32> to vector<8xf32>
    %57 = vector.shape_cast %56 : vector<8xf32> to vector<8x1xf32>
    %cst_26 = arith.constant 3.200000e+01 : f32
    %58 = vector.broadcast %cst_26 : f32 to vector<8x1xf32>
    %59 = arith.divf %57, %58 : vector<8x1xf32>
    %60 = vector.broadcast %52 : vector<8x1xf32> to vector<8x32xf32>
    %61 = arith.subf %46, %60 : vector<8x32xf32>
    %cst_27 = arith.constant 9.99999974E-6 : f32
    %62 = vector.broadcast %cst_27 : f32 to vector<8x1xf32>
    %63 = arith.addf %59, %62 : vector<8x1xf32>
    %64 = math.rsqrt %63 : vector<8x1xf32>
    %65 = vector.broadcast %64 : vector<8x1xf32> to vector<8x32xf32>
    %66 = arith.mulf %61, %65 : vector<8x32xf32>
    %67 = vector.broadcast %47 : vector<1x32xf32> to vector<8x32xf32>
    %68 = arith.mulf %66, %67 : vector<8x32xf32>
    %69 = vector.broadcast %48 : vector<1x32xf32> to vector<8x32xf32>
    %70 = arith.addf %68, %69 : vector<8x32xf32>
    %c0_28 = arith.constant 0 : index
    %c0_29 = arith.constant 0 : index
    %71 = vector.load %arg12[%c0_28, %c0_29] : memref<32x128xf32, #tpu.memory_space<vmem>>, vector<32x128xf32>
    %cst_30 = arith.constant dense<0.000000e+00> : vector<8x128xf32>
    %72 = tpu.matmul %70, %71, %cst_30 {dimension_numbers = #tpu.dot_dimension_numbers<[1], [0], [0], [1], [0, 0, 1, 1], [], []>} : vector<8x32xf32>, vector<32x128xf32>, vector<8x128xf32> -> vector<8x128xf32>
    %c0_31 = arith.constant 0 : index
    %c0_32 = arith.constant 0 : index
    %73 = vector.load %arg13[%c0_31, %c0_32] : memref<1x128xf32, #tpu.memory_space<vmem>>, vector<1x128xf32>
    %74 = vector.broadcast %73 : vector<1x128xf32> to vector<8x128xf32>
    %75 = arith.addf %72, %74 : vector<8x128xf32>
    %cst_33 = arith.constant 5.000000e-01 : f32
    %76 = vector.broadcast %cst_33 : f32 to vector<8x128xf32>
    %77 = arith.mulf %76, %75 : vector<8x128xf32>
    %cst_34 = arith.constant 4.471500e-02 : f32
    %78 = vector.broadcast %cst_34 : f32 to vector<8x128xf32>
    %79 = arith.mulf %78, %75 : vector<8x128xf32>
    %80 = arith.mulf %79, %75 : vector<8x128xf32>
    %81 = arith.mulf %80, %75 : vector<8x128xf32>
    %82 = arith.addf %75, %81 : vector<8x128xf32>
    %cst_35 = arith.constant 0.797884583 : f32
    %83 = vector.broadcast %cst_35 : f32 to vector<8x128xf32>
    %84 = arith.mulf %83, %82 : vector<8x128xf32>
    %85 = math.tanh %84 : vector<8x128xf32>
    %cst_36 = arith.constant 1.000000e+00 : f32
    %86 = vector.broadcast %cst_36 : f32 to vector<8x128xf32>
    %87 = arith.addf %86, %85 : vector<8x128xf32>
    %88 = arith.mulf %77, %87 : vector<8x128xf32>
    %c0_37 = arith.constant 0 : index
    %c0_38 = arith.constant 0 : index
    %89 = vector.load %arg14[%c0_37, %c0_38] : memref<128x32xf32, #tpu.memory_space<vmem>>, vector<128x32xf32>
    %cst_39 = arith.constant dense<0.000000e+00> : vector<8x32xf32>
    %90 = tpu.matmul %88, %89, %cst_39 {dimension_numbers = #tpu.dot_dimension_numbers<[1], [0], [0], [1], [0, 0, 1, 1], [], []>} : vector<8x128xf32>, vector<128x32xf32>, vector<8x32xf32> -> vector<8x32xf32>
    %c0_40 = arith.constant 0 : index
    %c0_41 = arith.constant 0 : index
    %91 = vector.load %arg15[%c0_40, %c0_41] : memref<1x32xf32, #tpu.memory_space<vmem>>, vector<1x32xf32>
    %92 = vector.broadcast %91 : vector<1x32xf32> to vector<8x32xf32>
    %93 = arith.addf %90, %92 : vector<8x32xf32>
    %94 = arith.addf %46, %93 : vector<8x32xf32>
    %c0_42 = arith.constant 0 : index
    %c0_43 = arith.constant 0 : index
    %c0_44 = arith.constant 0 : index
    %95 = vector.load %arg18[%c0_42, %c0_43, %c0_44] : memref<1x8x32xf32, #tpu.memory_space<vmem>>, vector<1x8x32xf32>
    %96 = vector.shape_cast %95 : vector<1x8x32xf32> to vector<8x32xf32>
    %97 = vector.shape_cast %94 : vector<8x32xf32> to vector<1x8x32xf32>
    tpu.vector_store %arg18[%c0_42, %c0_43, %c0_44], %97 {strides = array<i32>} : memref<1x8x32xf32, #tpu.memory_space<vmem>>, vector<1x8x32xf32>,
    return
  }
  func.func @transform_0(%arg0: i32, %arg1: i32) -> (i32, i32, i32) {
    %c0_i32 = arith.constant 0 : i32
    %c0_i32_0 = arith.constant 0 : i32
    %c0_i32_1 = arith.constant 0 : i32
    return %arg0, %c0_i32, %c0_i32_0 : i32, i32, i32
  }
  func.func @transform_1(%arg0: i32, %arg1: i32) -> (i32, i32, i32) {
    %c0_i32 = arith.constant 0 : i32
    %c0_i32_0 = arith.constant 0 : i32
    %c0_i32_1 = arith.constant 0 : i32
    return %arg0, %c0_i32, %c0_i32_0 : i32, i32, i32
  }
  func.func @transform_2(%arg0: i32, %arg1: i32) -> (i32, i32) {
    %c0_i32 = arith.constant 0 : i32
    %c0_i32_0 = arith.constant 0 : i32
    %c0_i32_1 = arith.constant 0 : i32
    return %c0_i32, %c0_i32_0 : i32, i32
  }
  func.func @transform_3(%arg0: i32, %arg1: i32) -> (i32, i32) {
    %c0_i32 = arith.constant 0 : i32
    %c0_i32_0 = arith.constant 0 : i32
    %c0_i32_1 = arith.constant 0 : i32
    return %c0_i32, %c0_i32_0 : i32, i32
  }
  func.func @transform_4(%arg0: i32, %arg1: i32) -> (i32, i32) {
    %c0_i32 = arith.constant 0 : i32
    %c0_i32_0 = arith.constant 0 : i32
    %c0_i32_1 = arith.constant 0 : i32
    return %c0_i32, %c0_i32_0 : i32, i32
  }
  func.func @transform_5(%arg0: i32, %arg1: i32) -> (i32, i32) {
    %c0_i32 = arith.constant 0 : i32
    %c0_i32_0 = arith.constant 0 : i32
    %c0_i32_1 = arith.constant 0 : i32
    return %c0_i32, %c0_i32_0 : i32, i32
  }
  func.func @transform_6(%arg0: i32, %arg1: i32) -> (i32, i32) {
    %c0_i32 = arith.constant 0 : i32
    %c0_i32_0 = arith.constant 0 : i32
    %c0_i32_1 = arith.constant 0 : i32
    return %c0_i32, %c0_i32_0 : i32, i32
  }
  func.func @transform_7(%arg0: i32, %arg1: i32) -> (i32, i32) {
    %c0_i32 = arith.constant 0 : i32
    %c0_i32_0 = arith.constant 0 : i32
    %c0_i32_1 = arith.constant 0 : i32
    return %c0_i32, %c0_i32_0 : i32, i32
  }
  func.func @transform_8(%arg0: i32, %arg1: i32) -> (i32, i32) {
    %c0_i32 = arith.constant 0 : i32
    %c0_i32_0 = arith.constant 0 : i32
    %c0_i32_1 = arith.constant 0 : i32
    return %c0_i32, %c0_i32_0 : i32, i32
  }
  func.func @transform_9(%arg0: i32, %arg1: i32) -> (i32, i32) {
    %c0_i32 = arith.constant 0 : i32
    %c0_i32_0 = arith.constant 0 : i32
    %c0_i32_1 = arith.constant 0 : i32
    return %c0_i32, %c0_i32_0 : i32, i32
  }
  func.func @transform_10(%arg0: i32, %arg1: i32) -> (i32, i32) {
    %c0_i32 = arith.constant 0 : i32
    %c0_i32_0 = arith.constant 0 : i32
    %c0_i32_1 = arith.constant 0 : i32
    return %c0_i32, %c0_i32_0 : i32, i32
  }
  func.func @transform_11(%arg0: i32, %arg1: i32) -> (i32, i32) {
    %c0_i32 = arith.constant 0 : i32
    %c0_i32_0 = arith.constant 0 : i32
    %c0_i32_1 = arith.constant 0 : i32
    return %c0_i32, %c0_i32_0 : i32, i32
  }
  func.func @transform_12(%arg0: i32, %arg1: i32) -> (i32, i32) {
    %c0_i32 = arith.constant 0 : i32
    %c0_i32_0 = arith.constant 0 : i32
    %c0_i32_1 = arith.constant 0 : i32
    return %c0_i32, %c0_i32_0 : i32, i32
  }
  func.func @transform_13(%arg0: i32, %arg1: i32) -> (i32, i32) {
    %c0_i32 = arith.constant 0 : i32
    %c0_i32_0 = arith.constant 0 : i32
    %c0_i32_1 = arith.constant 0 : i32
    return %c0_i32, %c0_i32_0 : i32, i32
  }
  func.func @transform_14(%arg0: i32, %arg1: i32) -> (i32, i32) {
    %c0_i32 = arith.constant 0 : i32
    %c0_i32_0 = arith.constant 0 : i32
    %c0_i32_1 = arith.constant 0 : i32
    return %c0_i32, %c0_i32_0 : i32, i32
  }
  func.func @transform_15(%arg0: i32, %arg1: i32) -> (i32, i32) {
    %c0_i32 = arith.constant 0 : i32
    %c0_i32_0 = arith.constant 0 : i32
    %c0_i32_1 = arith.constant 0 : i32
    return %c0_i32, %c0_i32_0 : i32, i32
  }
  func.func @transform_16(%arg0: i32, %arg1: i32) -> (i32, i32, i32) {
    %c0_i32 = arith.constant 0 : i32
    %c0_i32_0 = arith.constant 0 : i32
    return %arg0, %arg1, %c0_i32 : i32, i32, i32
  }
}

</mosaic_0001>

<bundles_post_ra>
// kernel: tpu_custom_call.1
= control target key start
LH: loop header
LB: loop body
LE: loop exit
PB: predicated region body
PF: predicated region fallthrough
CT: control target
= control target key end

     0   :  { %s2394_s0 = inlined_call_operand.vmem [shape: f32[2,8,32], index: 0, kind: input, shape index: {}]   ;;  %s2395_s1 = inlined_call_operand.vmem [shape: f32[2,1,8], index: 1, kind: input, shape index: {}]   ;;  %s2396_s2 = inlined_call_operand.vmem [shape: f32[1,32], index: 2, kind: input, shape index: {}]   ;;  %s2397_s3 = inlined_call_operand.vmem [shape: f32[1,32], index: 3, kind: input, shape index: {}]   ;;  %s2398_s4 = inlined_call_operand.vmem [shape: f32[32,96], index: 4, kind: input, shape index: {}]   ;;  %s2399_s5 = inlined_call_operand.vmem [shape: f32[1,96], index: 5, kind: input, shape index: {}]   ;;  %s2400_s6 = inlined_call_operand.vmem [shape: f32[32,32], index: 6, kind: input, shape index: {}]   ;;  %s2401_s7 = inlined_call_operand.vmem [shape: f32[1,32], index: 7, kind: input, shape index: {}]   ;;  %s2402_s8 = inlined_call_operand.vmem [shape: f32[1,32], index: 8, kind: input, shape index: {}]   ;;  %s2403_s9 = inlined_call_operand.vmem [shape: f32[1,32], index: 9, kind: input, shape index: {}]   ;;  %s2404_s10 = inlined_call_operand.vmem [shape: f32[32,128], index: 10, kind: input, shape index: {}]   ;;  %s2405_s11 = inlined_call_operand.vmem [shape: f32[1,128], index: 11, kind: input, shape index: {}]   ;;  %s2406_s12 = inlined_call_operand.vmem [shape: f32[128,32], index: 12, kind: input, shape index: {}]   ;;  %s2407_s13 = inlined_call_operand.vmem [shape: f32[1,32], index: 13, kind: input, shape index: {}]   ;;  %s2408_s14 = inlined_call_operand.vmem [shape: f32[1,32], index: 14, kind: input, shape index: {}]   ;;  %s2409_s15 = inlined_call_operand.vmem [shape: f32[1,32], index: 15, kind: input, shape index: {}]   ;;  %s2410_s16 = inlined_call_operand.hbm [shape: f32[2,8,32], index: 16, kind: output, shape index: {}]  }
   0x1   :  { %2413 = sst [smem:[#allocation10_spill]] %s2394_s0 }
   0x2   :  { %2414 = sst [smem:[#allocation11_spill]] %s2395_s1 }
   0x3   :  { %2415 = sst [smem:[#allocation12_spill]] %s2396_s2 }
   0x4   :  { %2416 = sst [smem:[#allocation13_spill]] %s2397_s3 }
   0x5   :  { %21 = vsyncpa [#allocation6], 0 }
   0x6   :  { %23 = vsyncpa [#allocation6 + $0x1], 0  ;;  %s2105_s21 = smov 0   ;;  %s2107_s22 = smov 0  }
   0x7   :  { %s2109_s23 = smov 0   ;;  %s2111_s24 = smov 0  }
   0x8   :  { %s2113_s25 = smov 0   ;;  %s2115_s26 = smov 0  }
   0x9 LB: > { %2417 = sst [smem:[#allocation8_spill]] %s2003_s25  ;;  %s1793_s14 = sadd.s32 4294967295, %s2007_s26   ;;  %s2007_s26 = sphi %s2115_s26, %s29_s26   ;;  %s2003_s25 = sphi %s2113_s25, %s2427_s25   ;;  %s1999_s24 = sphi %s2111_s24, %s2426_s24   ;;  %s1995_s23 = sphi %s2109_s23, %s2430_s23   ;;  %s1991_s22 = sphi %s2107_s22, %s2429_s22   ;;  %s1987_s21 = sphi %s2105_s21, %s2428_s21  }
   0xa   : > { %s1794_s15 = sadd.s32 4294967294, %s2007_s26   ;;  %s41_s27 = sadd.s32 1, %s2003_s25 }
   0xb   : > { %s396_s28 = sadd.s32 1, %s1995_s23  ;;  %p43_p0 = scmp.ge.s32.totalorder %s41_s27, 2 }
   0xc   : > { %p406_p1 = scmp.ne.s32.totalorder %s1995_s23, %s1991_s22  ;;  %p407_p2 = scmp.eq.s32.totalorder %s1793_s14, 1 }
   0xd   : > { %p412_p3 = scmp.ne.s32.totalorder %s1991_s22, %s1987_s21  ;;  %s2432_s27 = smov (%p43_p0, %s41_s27), 0 }
   0xe   : > { %2418 = sst [smem:[#allocation9_spill]] %s2432_s27  ;;  %p2145_p4 = por %p407_p2, %p406_p1 }
   0xf   : > { %p413_p5 = scmp.eq.s32.totalorder %s1794_s15, 1  ;;  %s391_s30 = ssub.s32 %s2003_s25, %s2432_s27 }
  0x10   : > { %p1797_p6 = scmp.ge.s32.totalorder %s2007_s26, 1  ;;  %p394_p7 = scmp.eq.s32.totalorder %s391_s30, 0 }
  0x11   : > { %p2152_p8 = por %p413_p5, %p412_p3  ;;  %p486_p9 = scmp.lt.s32.totalorder %s2007_s26, 3 }
  0x12   : > { %s2158_s17 = scalar_select %p394_p7, %s1995_s23, %s396_s28  }
  0x13   : > { %p487_p10 = pnand %p1797_p6, %p486_p9 }
  0x14   : > { %p538_p11 = scmp.lt.s32.totalorder (!%p487_p10), %s1999_s24, 1  ;;  %s2421_s1 = sld [smem:[#allocation11_spill]] (!%p487_p10) }
  0x15   : > { %490 = sbr.rel (%p487_p10) target bundleno = 2500 (0x9c4), region = 84  ;;  %s2422_s25 = sld [smem:[#allocation10_spill]] (!%p487_p10) }
  0x16   : > { %s2423_s2 = sld [smem:[#allocation12_spill]] (!%p487_p10)  ;;  %s2010_s30 = smov (!%p487_p10), 64  }
  0x17   : > { %s2424_s3 = sld [smem:[#allocation13_spill]] (!%p487_p10)  ;;  %s2013_s27 = smov (!%p487_p10), 120  }
  0x18   : > { %s2014_s15 = smov (!%p487_p10), 112  }
  0x1a   : > { %s2162_s18 = scalar_select %p538_p11, %s1999_s24, 1  ;;  %vm553_vm0 = vcmask 261120   ;;  %v2009_v2 = vmov 32.0   ;;  %v594_v14 = vld [vmem:[%s2398_s4 + $0x18] sm:$0xff]  ;;  %v593_v15 = vld [vmem:[%s2398_s4 + $0x10] sm:$0xff]  ;;  %v592_v16 = vld [vmem:[%s2398_s4 + $0x8] sm:$0xff] }
  0x1b   : > { %1905 = vrcp.f32 %v2009_v2  ;;  %614 = vmatpush.msra.mxu1 %v594_v14  ;;  %v591_v17 = vld [vmem:[%s2398_s4] sm:$0xff]  ;;  %vm797_vm5 = vcmask 64512   ;;  %vm1365_vm6 = vcmask 1041409   ;;  %vm1367_vm7 = vcmask 1042434  }
  0x1c   : > { %s1799_s19 = sshll.u32 %s2162_s18, 3  ;;  %v1897_v27 = vld [vmem:[%s2423_s2] ss:$0 sm:$0xff]  ;;  %s2425_s14 = scalar_lea.vmem %s2421_s1, %s2162_s18  ;;  %vm1369_vm8 = vcmask 1043459   ;;  %vm1299_vm9 = vcmask 1047556   ;;  %vm1537_vm10 = vcmask 130048  }
  0x1d   : > { %s541_s28 = scalar_lea.vmem %s2422_s25, %s1799_s19  ;;  %615 = vmatpush.msra.mxu1 %v593_v15  ;;  %v1898_v30 = vld [vmem:[%s2424_s3] ss:$0 sm:$0xff]  ;;  %s2012_s25 = smov 104   ;;  %vm1539_vm11 = vcmask 195584  }
  0x1e   : > { %v2172_v0 = vld [vmem:[%s541_s28] sm:$0xff]  ;;  %s2011_s28 = smov 96   ;;  %s2017_s18 = smov 24  }
  0x1f   : > { %v554_v1 = vsel %vm553_vm0, %v2172_v0, 0.0  ;;  %616 = vmatpush.msra.mxu1 %v592_v16  ;;  %v1899_v33 = vld [vmem:[%s2399_s5] ss:$0 sm:$0xff]  ;;  %s535_s1 = sand.u32 1, %s1991_s22  }
  0x20   : > { %555 = vadd.xlane.f32.xlu0 %v554_v1  ;;  %v1896_v56 = vld [vmem:[%s2425_s14] ss:$0 sm:$0xff] }
  0x21   : > { %v1906_v3 = vpop.eup %1905  ;;  %617 = vmatpush.msra.mxu1 %v591_v17 }
  0x22   : > { %v558_v4 = vmul.f32 32.0, %v1906_v3  ;;  %vm562_vm1 = vweird.f32 %v1906_v3 }
  0x24   : > { %v559_v5 = vsub.f32 1.0, %v558_v4 }
  0x26   : > { %v560_v6 = vmul.f32 %v1906_v3, %v559_v5 }
  0x28   : > { %v561_v7 = vadd.f32 %v1906_v3, %v560_v6 }
  0x2a   : > { %v2176_v8 = vsel %vm562_vm1, %v1906_v3, %v561_v7 }
  0x93   : > { %v556_v9 = vpop.xlane.xlu0 %555 }
  0x94   : > { %v564_v10 = vmul.f32 %v2176_v8, %v556_v9 }
  0x96   : > { %v565_v11 = vsub.f32 %v2172_v0, %v564_v10 }
  0x98   : > { %v566_v12 = vmul.f32 %v565_v11, %v565_v11 }
  0x9a   : > { %v567_v13 = vsel %vm553_vm0, %v566_v12, 0.0 }
  0x9b   : > { %568 = vadd.xlane.f32.xlu0 %v567_v13 }
 0x10e   : > { %v569_v18 = vpop.xlane.xlu0 %568 }
 0x10f   : > { %v570_v19 = vmul.f32 %v569_v18, %v2176_v8 }
 0x111   : > { %v571_v20 = vadd.f32 1e-05, %v570_v19 }
 0x113   : > { %1907 = vrsqrt.f32 %v571_v20  ;;  %vm578_vm3 = vweird.f32 %v571_v20 }
 0x119   : > { %v1908_v21 = vpop.eup %1907 }
 0x11a   : > { %v573_v22 = vmul.f32 %v1908_v21, %v571_v20  ;;  %vm579_vm2 = vweird.f32 %v1908_v21 }
 0x11b   : > { %vm580_vm4 = vmor %vm578_vm3, %vm579_vm2 }
 0x11c   : > { %v574_v23 = vmul.f32 %v1908_v21, %v573_v22 }
 0x11e   : > { %v575_v24 = vmul.f32 0.5, %v574_v23 }
 0x120   : > { %v576_v25 = vsub.f32 1.5, %v575_v24 }
 0x122   : > { %v577_v26 = vmul.f32 %v1908_v21, %v576_v25 }
 0x124   : > { %v581_v28 = vsel %vm580_vm4, %v1908_v21, %v577_v26 }
 0x125   : > { %v582_v29 = vmul.f32 %v581_v28, %v565_v11 }
 0x127   : > { %v586_v31 = vmul.f32 %v1897_v27, %v582_v29 }
 0x129   : > { %v590_v32 = vadd.f32 %v1898_v30, %v586_v31 }
 0x12b   : > { %1800 = vmatmul.msk.f32.vlgmr.msra.gmra.mxu1 %vm553_vm0, %v590_v32 }
 0x1a8   : > { %v619_v34 = vpop.f32.mrf.mxu1 }
 0x1a9   : > { %v620_v35 = vadd.f32 %v1899_v33, %v619_v34 }
 0x1ab   : > { %622 = vst.msk [vmem:[#allocation2] sm:$0xff] %vm553_vm0, %v620_v35  ;;  %628 = vrot.lane.b32.xlu2 %v620_v35, %s2010_s30  ;;  %624 = vrot.lane.b32.xlu1 %v620_v35, %s2011_s28  ;;  %s2018_s30 = smov 16   ;;  %s2019_s28 = smov 8  }
 0x1b2   : > { %v636_v36 = vld [vmem:[#allocation2] sm:$0xff] }
 0x1b3   : > { %642 = vrot.lane.b32.xlu2 %v636_v36, %s2012_s25  ;;  %638 = vrot.lane.b32.xlu1 %v636_v36, %s2013_s27 }
 0x1b4   : > { %640 = vrot.lane.b32.xlu0 %v636_v36, %s2014_s15 }
 0x205   : > { %v629_v37 = vpop.permute.xlu2 %628 }
 0x206   : > { %631 = vst.msk [vmem:[#allocation4] sm:$0xff] %vm553_vm0, %v629_v37 }
 0x20d   : > { %v655_v38 = vld [vmem:[#allocation4] sm:$0xff]  ;;  %v643_v41 = vpop.permute.xlu2 %642 }
 0x20e   : > { %663 = vrot.lane.b32.xlu0 %v655_v38, %s2012_s25 }
 0x21d   : > { %v625_v39 = vpop.permute.xlu1 %624 }
 0x21e   : > { %627 = vst.msk [vmem:[#allocation3] sm:$0xff] %vm553_vm0, %v625_v39 }
 0x225   : > { %v644_v40 = vld [vmem:[#allocation3] sm:$0xff]  ;;  %v639_v44 = vpop.permute.xlu1 %638 }
 0x226   : > { %646 = vrot.lane.b32.xlu2 %v644_v40, %s2013_s27  ;;  %649 = vrot.lane.b32.xlu1 %v644_v40, %s2014_s15  ;;  %v641_v47 = vpop.permute.xlu0 %640 }
 0x22e   : > { %652 = vrot.lane.b32.xlu2 %v644_v40, %s2012_s25  ;;  %660 = vrot.lane.b32.xlu1 %v655_v38, %s2014_s15 }
 0x236   : > { %657 = vrot.lane.b32.xlu2 %v655_v38, %s2013_s27 }
 0x280   : > { %v647_v42 = vpop.permute.xlu2 %646  ;;  %v664_v49 = vpop.permute.xlu0 %663 }
 0x281   : > { %701 = vxpose.xlu2.b32.start.end [1/1] (short) (narrow) %v647_v42, 8 }
 0x288   : > { %v653_v43 = vpop.permute.xlu2 %652 }
 0x289   : > { %765 = vxpose.xlu0.b32.start.end [1/1] (short) (narrow) %v653_v43, 8 }
 0x290   : > { %v658_v50 = vpop.permute.xlu2 %657 }
 0x298   : > { %v650_v45 = vpop.permute.xlu1 %649 }
 0x299   : > { %v1886_v46 = vpack.i.bf16 %v650_v45, %v644_v40 }
 0x29b   : > { %1887 = vxpose.xlu1.b32.start.end [1/1] (short) (narrow) %v1886_v46, 8 }
 0x2a0   : > { %v661_v48 = vpop.permute.xlu1 %660 }
 0x2a1   : > { %1002 = vxpose.xlu2.b32.start.end [1/1] (short) (narrow) %v661_v48, 8 }
 0x2a9   : > { %1034 = vxpose.xlu2.b32.start.end [1/1] (short) (narrow) %v664_v49, 8 }
 0x31a   : > { %v717_v51 = vpop.trf.xlu2 }
 0x31b   : > { %837 = vmatpush.msra.mxu2 %v717_v51 }
 0x31c   : > { %1802 = vmatmul.msk.f32.vlgmr.msra.gmra.mxu2 %vm797_vm5, %v639_v44 }
 0x32d   : > { %v781_v55 = vpop.trf.xlu0 }
 0x33a   : > { %v1018_v6 = vpop.trf.xlu2 }
 0x33f   : > { %v1888_v52 = vpop.trf.xlu1 }
 0x340   : > { %v1889_v53 = vunpack.i.l.bf16 %v1888_v52  ;;  %v1892_v54 = vunpack.i.h.bf16 %v1888_v52 }
 0x342   : > { %815 = vmatpush.msrb.mxu1 %v1889_v53  ;;  %859 = vmatpush.msra.mxu3 %v1892_v54  ;;  %v1050_v7 = vpop.trf.xlu2 }
 0x343   : > { %1801 = vmatmul.msk.f32.vlgmr.msrb.gmra.mxu1 %vm797_vm5, %v636_v36  ;;  %1803 = vmatmul.msk.f32.vlgmr.msra.gmra.mxu3 %vm797_vm5, %v641_v47 }
 0x344   : > { %881 = vmatpush.msra.mxu1 %v781_v55 }
 0x34b   : > { %1804 = vmatmul.msk.f32.vlgmr.msra.gmra.mxu1 %vm797_vm5, %v643_v41  ;;  %v1359_v41 = vlaneseq }
 0x34d   : > { %v1360_v47 = vand.u32 127, %v1359_v41 }
 0x39f   : > { %v839_v57 = vpop.f32.mrf.mxu2 }
 0x3a0   : > { %v840_v58 = vadd.f32 %v1896_v56, %v839_v57 }
 0x3a2   : > { %v889_v59 = vsel %vm797_vm5, %v840_v58, -inf }
 0x3a3   : > { %890 = vmax.xlane.f32.xlu2 %v889_v59 }
 0x3c0   : > { %v817_v60 = vpop.f32.mrf.mxu1 }
 0x3c1   : > { %v818_v61 = vadd.f32 %v1896_v56, %v817_v60  ;;  %v1406_v60 = vshrl.u32 %v1359_v41, 7 }
 0x3c3   : > { %v886_v62 = vsel %vm797_vm5, %v818_v61, -inf }
 0x3c4   : > { %887 = vmax.xlane.f32.xlu0 %v886_v62 }
 0x3c6   : > { %v861_v63 = vpop.f32.mrf.mxu3 }
 0x3c7   : > { %v862_v1 = vadd.f32 %v1896_v56, %v861_v63 }
 0x3c8   : > { %v883_v2 = vpop.f32.mrf.mxu1 }
 0x3c9   : > { %v884_v3 = vadd.f32 %v1896_v56, %v883_v2  ;;  %v892_v4 = vsel %vm797_vm5, %v862_v1, -inf }
 0x3ca   : > { %893 = vmax.xlane.f32.xlu1 %v892_v4 }
 0x3cb   : > { %v895_v5 = vsel %vm797_vm5, %v884_v3, -inf }
 0x3cc   : > { %896 = vmax.xlane.f32.xlu0 %v895_v5 }
 0x3f5   : > { %970 = vxpose.xlu0.b32.start.end [1/1] (short) (narrow) %v658_v50, 8 }
 0x404   : > { %938 = vxpose.xlu1.b32.start.end [1/1] (short) (narrow) %v655_v38, 8 }
 0x416   : > { %v891_v9 = vpop.xlane.xlu2 %890 }
 0x417   : > { %v899_v10 = vsub.f32 %v840_v58, %v891_v9 }
 0x419   : > { %v904_v11 = vmul.f32 1.442695, %v899_v10 }
 0x41b   : > { %1909 = vpow2.f32 %v904_v11 }
 0x421   : > { %v1910_v12 = vpop.eup %1909 }
 0x422   : > { %1807 = vmatpush.xpose.msk.msrb.mxu3 %vm797_vm5, %v1910_v12  ;;  %v913_v28 = vsel %vm797_vm5, %v1910_v12, 0.0 }
 0x437   : > { %v888_v13 = vpop.xlane.xlu0 %887 }
 0x438   : > { %v898_v14 = vsub.f32 %v818_v61, %v888_v13 }
 0x43a   : > { %v902_v15 = vmul.f32 1.442695, %v898_v14 }
 0x43c   : > { %1911 = vpow2.f32 %v902_v15 }
 0x43d   : > { %v894_v16 = vpop.xlane.xlu1 %893 }
 0x43e   : > { %v900_v17 = vsub.f32 %v862_v1, %v894_v16 }
 0x43f   : > { %v897_v18 = vpop.xlane.xlu0 %896 }
 0x440   : > { %v906_v19 = vmul.f32 1.442695, %v900_v17  ;;  %v901_v20 = vsub.f32 %v884_v3, %v897_v18 }
 0x442   : > { %v1912_v21 = vpop.eup %1911  ;;  %1913 = vpow2.f32 %v906_v19  ;;  %v908_v22 = vmul.f32 1.442695, %v901_v20 }
 0x443   : > { %1805 = vmatpush.xpose.msk.msrb.mxu2 %vm797_vm5, %v1912_v21  ;;  %v910_v23 = vsel %vm797_vm5, %v1912_v21, 0.0 }
 0x444   : > { %1915 = vpow2.f32 %v908_v22  ;;  %911 = vadd.xlane.f32.xlu2 %v910_v23  ;;  %v2015_v22 = vmov 1983009808  }
 0x445   : > { %v1304_v23 = vunpack.c.l.s4 %v2015_v22 }
 0x448   : > { %v1914_v24 = vpop.eup %1913 }
 0x449   : > { %1809 = vmatpush.xpose.msk.msra.mxu2 %vm797_vm5, %v1914_v24  ;;  %v916_v27 = vsel %vm797_vm5, %v1914_v24, 0.0 }
 0x44a   : > { %v1916_v25 = vpop.eup %1915 }
 0x44b   : > { %1811 = vmatpush.xpose.msk.msrb.mxu1 %vm797_vm5, %v1916_v25  ;;  %v919_v26 = vsel %vm797_vm5, %v1916_v25, 0.0 }
 0x44e   : > { %1812 = vmatmul.msk.f32.vlgmr.msrb.gmra.mxu1 %vm797_vm5, %v1050_v7 }
 0x45c   : > { %1893 = vset.pattern.permute.xlu0 %v1406_v60 }
 0x464   : > { %920 = vadd.xlane.f32.xlu1 %v919_v26 }
 0x466   : > { %917 = vadd.xlane.f32.xlu0 %v916_v27  ;;  %v1305_v27 = vunpack.c.0.s8 %v1304_v23 }
 0x46c   : > { %914 = vadd.xlane.f32.xlu1 %v913_v28 }
 0x499   : > { %v986_v29 = vpop.trf.xlu0 }
 0x49a   : > { %1808 = vmatmul.msk.f32.vlgmr.msrb.gmra.mxu3 %vm797_vm5, %v986_v29 }
 0x4a8   : > { %v954_v30 = vpop.trf.xlu1 }
 0x4a9   : > { %1806 = vmatmul.msk.f32.vlgmr.msrb.gmra.mxu2 %vm797_vm5, %v954_v30  ;;  %v2016_v30 = vmov 1934713408  }
 0x4b1   : > { %1810 = vmatmul.msk.f32.vlgmr.msra.gmra.mxu2 %vm797_vm5, %v1018_v6 }
 0x4b7   : > { %v912_v31 = vpop.xlane.xlu2 %911 }
 0x4b8   : > { %1917 = vrcp.f32 %v912_v31 }
 0x4be   : > { %v1918_v34 = vpop.eup %1917 }
 0x4bf   : > { %v926_v38 = vmul.f32 %v1918_v34, %v912_v31  ;;  %v1328_v31 = vunpack.c.l.s4 %v2016_v30 }
 0x4c1   : > { %v930_v42 = vsub.f32 2.0, %v926_v38 }
 0x4c3   : > { %v934_v48 = vmul.f32 %v1918_v34, %v930_v42 }
 0x4c5   : > { %v1361_v53 = vperm.slane %v934_v48, %v1360_v47 }
 0x4cb   : > { %v1167_v10 = vpop.f32.mrf.mxu1 }
 0x4d7   : > { %v921_v32 = vpop.xlane.xlu1 %920 }
 0x4d8   : > { %1919 = vrcp.f32 %v921_v32 }
 0x4d9   : > { %v918_v33 = vpop.xlane.xlu0 %917 }
 0x4da   : > { %1921 = vrcp.f32 %v918_v33 }
 0x4de   : > { %v1920_v35 = vpop.eup %1919 }
 0x4df   : > { %v915_v36 = vpop.xlane.xlu1 %914  ;;  %v929_v40 = vmul.f32 %v1920_v35, %v921_v32 }
 0x4e0   : > { %v1922_v37 = vpop.eup %1921  ;;  %1923 = vrcp.f32 %v915_v36 }
 0x4e1   : > { %v928_v39 = vmul.f32 %v1922_v37, %v918_v33  ;;  %v933_v45 = vsub.f32 2.0, %v929_v40 }
 0x4e3   : > { %v932_v44 = vsub.f32 2.0, %v928_v39  ;;  %v937_v51 = vmul.f32 %v1920_v35, %v933_v45  ;;  %v1329_v35 = vunpack.c.0.s8 %v1328_v31 }
 0x4e5   : > { %v936_v50 = vmul.f32 %v1922_v37, %v932_v44  ;;  %v1364_v56 = vperm.slane %v937_v51, %v1360_v47 }
 0x4e6   : > { %v1924_v43 = vpop.eup %1923 }
 0x4e7   : > { %v927_v46 = vmul.f32 %v1924_v43, %v915_v36  ;;  %v1363_v55 = vperm.slane %v936_v50, %v1360_v47 }
 0x4e9   : > { %v931_v49 = vsub.f32 2.0, %v927_v46 }
 0x4eb   : > { %v935_v52 = vmul.f32 %v1924_v43, %v931_v49 }
 0x4ed   : > { %v1362_v54 = vperm.slane %v935_v52, %v1360_v47 }
 0x4ef   : > { %v1366_v57 = vsel %vm1365_vm6, %v1362_v54, %v1361_v53 }
 0x4f0   : > { %v1368_v58 = vsel %vm1367_vm7, %v1363_v55, %v1366_v57 }
 0x4f1   : > { %v1370_v59 = vsel %vm1369_vm8, %v1364_v56, %v1368_v58 }
 0x4f2   : > { %1372 = vxpose.xlu1.b32.start.end [1/1] (short) (narrow) %v1370_v59, 8 }
 0x51d   : > { %v1115_v11 = vpop.f32.mrf.mxu3 }
 0x52c   : > { %v1089_v61 = vpop.f32.mrf.mxu2 }
 0x52d   : > { %1170 = vxpose.xlu2.b32.start.end [1/1] (short) (narrow) %v1089_v61, 8 }
 0x534   : > { %v1141_v7 = vpop.f32.mrf.mxu2 }
 0x545   : > { %1894 = vset.pattern.permute.xlu1 %v1406_v60 }
 0x58f   : > { %1895 = vset.pattern.permute.xlu2 %v1406_v60 }
 0x596   : > { %v1388_v62 = vpop.trf.xlu1 }
 0x597   : > { %v1446_v63 = vperm.slane %v1388_v62, 6  ;;  %v1425_v1 = vperm.slane %v1388_v62, 3  ;;  %v1404_v2 = vperm.slane %v1388_v62, 0  ;;  %v1411_v3 = vperm.slane %v1388_v62, 1 }
 0x598   : > { %v1418_v4 = vperm.slane %v1388_v62, 2  ;;  %v1453_v5 = vperm.slane %v1388_v62, 7  ;;  %v1432_v6 = vperm.slane %v1388_v62, 4  ;;  %v1439_v9 = vperm.slane %v1388_v62, 5 }
 0x599   : > { %1451 = vperm.xlu0 %1893, %v1446_v63   ;;  %1430 = vperm.xlu2 %1895, %v1425_v1  }
 0x59a   : > { %1409 = vperm.xlu1 %1894, %v1404_v2  }
 0x5a1   : > { %1416 = vperm.xlu2 %1895, %v1411_v3  }
 0x5a9   : > { %1423 = vperm.xlu2 %1895, %v1418_v4  }
 0x5b1   : > { %1458 = vperm.xlu2 %1895, %v1453_v5  }
 0x5b9   : > { %1437 = vperm.xlu2 %1895, %v1432_v6  }
 0x5bb   : > { %1234 = vxpose.xlu0.b32.start.end [1/1] (short) (narrow) %v1141_v7, 8 }
 0x5c1   : > { %1444 = vperm.xlu2 %1895, %v1439_v9  }
 0x5c3   : > { %1266 = vxpose.xlu0.b32.start.end [1/1] (short) (narrow) %v1167_v10, 8 }
 0x5c6   : > { %v1186_v12 = vpop.trf.xlu2 }
 0x5c7   : > { %v1301_v25 = vrot.slane %v1186_v12, 4 }
 0x5e7   : > { %1202 = vxpose.xlu2.b32.start.end [1/1] (short) (narrow) %v1115_v11, 8 }
 0x5f3   : > { %v1431_v13 = vpop.permute.xlu2 %1430 }
 0x5fb   : > { %v1417_v14 = vpop.permute.xlu2 %1416 }
 0x603   : > { %v1424_v15 = vpop.permute.xlu2 %1423 }
 0x60b   : > { %v1459_v16 = vpop.permute.xlu2 %1458  ;;  %v1452_v17 = vpop.permute.xlu0 %1451 }
 0x60c   : > { %v1410_v54 = vpop.permute.xlu1 %1409 }
 0x613   : > { %v1438_v18 = vpop.permute.xlu2 %1437 }
 0x61b   : > { %v1445_v21 = vpop.permute.xlu2 %1444 }
 0x65f   : > { %v1250_v19 = vpop.trf.xlu0 }
 0x660   : > { %v1298_v20 = vrot.slane %v1250_v19, 4  ;;  %v1302_v28 = vsel %vm1299_vm9, %v1250_v19, %v1301_v25 }
 0x661   : > { %v1310_v33 = vperm.slane %v1302_v28, %v1305_v27 }
 0x662   : > { %v1300_v26 = vsel %vm1299_vm9, %v1298_v20, %v1186_v12 }
 0x663   : > { %v1306_v32 = vperm.slane %v1300_v26, %v1305_v27  ;;  %v1337_v41 = vrot.slane %v1310_v33, 4 }
 0x665   : > { %v1325_v38 = vrot.slane %v1306_v32, 4 }
 0x667   : > { %v1282_v24 = vpop.trf.xlu0 }
 0x668   : > { %v1311_v29 = vrot.slane %v1282_v24, 4 }
 0x680   : > { %v1218_v34 = vpop.trf.xlu2 }
 0x681   : > { %v1312_v36 = vsel %vm1299_vm9, %v1311_v29, %v1218_v34  ;;  %v1313_v37 = vrot.slane %v1218_v34, 4 }
 0x682   : > { %v1318_v39 = vperm.slane %v1312_v36, %v1305_v27 }
 0x683   : > { %v1314_v40 = vsel %vm1299_vm9, %v1282_v24, %v1313_v37 }
 0x684   : > { %v1322_v42 = vperm.slane %v1314_v40, %v1305_v27  ;;  %v1323_v43 = vrot.slane %v1318_v39, 4  ;;  %v1326_v44 = vsel %vm1299_vm9, %v1318_v39, %v1325_v38 }
 0x685   : > { %v1334_v45 = vperm.slane %v1326_v44, %v1329_v35 }
 0x686   : > { %v1324_v46 = vsel %vm1299_vm9, %v1323_v43, %v1306_v32  ;;  %v1335_v47 = vrot.slane %v1322_v42, 4  ;;  %v1338_v48 = vsel %vm1299_vm9, %v1322_v42, %v1337_v41  ;;  %v1544_v41 = vld [vmem:[%s2400_s6 + $0x18] sm:$0xff]  ;;  %v1542_v42 = vld [vmem:[%s2400_s6 + $0x8] sm:$0xff]  ;;  %v1541_v43 = vld [vmem:[%s2400_s6] sm:$0xff] }
 0x687   : > { %v1330_v49 = vperm.slane %v1324_v46, %v1329_v35  ;;  %v1346_v50 = vperm.slane %v1338_v48, %v1329_v35  ;;  %v1349_v51 = vrot.slane %v1334_v45, 4  ;;  %v1462_v52 = vmul.f32 %v1424_v15, %v1334_v45  ;;  %1565 = vmatpush.msrb.mxu2 %v1544_v41 }
 0x688   : > { %v1336_v53 = vsel %vm1299_vm9, %v1335_v47, %v1310_v33 }
 0x689   : > { %v1342_v55 = vperm.slane %v1336_v53, %v1329_v35  ;;  %v1347_v56 = vrot.slane %v1330_v49, 4  ;;  %v1350_v57 = vsel %vm1299_vm9, 0.0, %v1349_v51  ;;  %v1353_v58 = vrot.slane %v1346_v50, 4 }
 0x68a   : > { %v1460_v59 = vmul.f32 %v1410_v54, %v1330_v49  ;;  %v1463_v60 = vmul.f32 %v1431_v13, %v1350_v57  ;;  %v1466_v61 = vmul.f32 %v1452_v17, %v1346_v50  ;;  %v1468_v62 = vrot.slane %v1462_v52, 4  ;;  %v1900_v50 = vld [vmem:[%s2401_s7] ss:$0 sm:$0xff] }
 0x68b   : > { %v1348_v63 = vsel %vm1299_vm9, 0.0, %v1347_v56  ;;  %v1351_v1 = vrot.slane %v1342_v55, 4  ;;  %v1354_v2 = vsel %vm1299_vm9, 0.0, %v1353_v58  ;;  %v1464_v3 = vmul.f32 %v1438_v18, %v1342_v55 }
 0x68c   : > { %v1461_v4 = vmul.f32 %v1417_v14, %v1348_v63  ;;  %v1469_v5 = vsel %vm1299_vm9, %v1468_v62, %v1460_v59  ;;  %v1474_v6 = vrot.slane %v1463_v60, 4  ;;  %v1480_v7 = vrot.slane %v1466_v61, 4  ;;  %v1616_v60 = vld [vmem:[%s2404_s10 + $0x18] sm:$0xff]  ;;  %v1614_v61 = vld [vmem:[%s2404_s10 + $0x8] sm:$0xff]  ;;  %v1613_v62 = vld [vmem:[%s2404_s10] sm:$0xff] }
 0x68d   : > { %v1352_v9 = vsel %vm1299_vm9, 0.0, %v1351_v1  ;;  %v1467_v10 = vmul.f32 %v1459_v16, %v1354_v2  ;;  %v1473_v11 = vperm.slane %v1469_v5, %v1305_v27  ;;  %1636 = vmatpush.msra.mxu3 %v1616_v60  ;;  %v1668_v63 = vld [vmem:[%s2406_s12 + $0x78] sm:$0xff]  ;;  %v1667_v1 = vld [vmem:[%s2406_s12 + $0x70] sm:$0xff]  ;;  %v1666_v2 = vld [vmem:[%s2406_s12 + $0x68] sm:$0xff] }
 0x68e   : > { %v1465_v12 = vmul.f32 %v1445_v21, %v1352_v9  ;;  %v1475_v13 = vsel %vm1299_vm9, %v1474_v6, %v1461_v4  ;;  %v1481_v15 = vsel %vm1299_vm9, %v1480_v7, %v1464_v3  ;;  %1673 = vmatpush.msra.mxu0 %v1668_v63  ;;  %v1665_v5 = vld [vmem:[%s2406_s12 + $0x60] sm:$0xff] }
 0x68f   : > { %v1479_v17 = vperm.slane %v1475_v13, %v1305_v27  ;;  %v1485_v19 = vperm.slane %v1481_v15, %v1305_v27  ;;  %v1486_v20 = vrot.slane %v1467_v10, 4  ;;  %v1494_v22 = vrot.slane %v1473_v11, 4 }
 0x690   : > { %1674 = vmatpush.msra.mxu0 %v1667_v1 }
 0x691   : > { %v1487_v18 = vsel %vm1299_vm9, %v1486_v20, %v1465_v12  ;;  %v1495_v14 = vsel %vm1299_vm9, %v1479_v17, %v1494_v22  ;;  %v1506_v23 = vrot.slane %v1485_v19, 4  ;;  %v1492_v24 = vrot.slane %v1479_v17, 4 }
 0x692   : > { %v1491_v25 = vperm.slane %v1487_v18, %v1305_v27  ;;  %v1503_v26 = vperm.slane %v1495_v14, %v1329_v35  ;;  %1675 = vmatpush.msra.mxu0 %v1666_v2  ;;  %v1664_v18 = vld [vmem:[%s2406_s12 + $0x58] sm:$0xff]  ;;  %v1663_v14 = vld [vmem:[%s2406_s12 + $0x50] sm:$0xff] }
 0x693   : > { %v1493_v16 = vsel %vm1299_vm9, %v1492_v24, %v1473_v11  ;;  %v1661_v24 = vld [vmem:[%s2406_s12 + $0x40] sm:$0xff] }
 0x694   : > { %v1507_v21 = vsel %vm1299_vm9, %v1491_v25, %v1506_v23  ;;  %v1522_v28 = vrot.slane %v1503_v26, 4  ;;  %v1499_v29 = vperm.slane %v1493_v16, %v1329_v35  ;;  %v1504_v30 = vrot.slane %v1491_v25, 4  ;;  %1676 = vmatpush.msra.mxu0 %v1665_v5  ;;  %v1662_v23 = vld [vmem:[%s2406_s12 + $0x48] sm:$0xff]  ;;  %v1660_v25 = vld [vmem:[%s2406_s12 + $0x38] sm:$0xff] }
 0x695   : > { %v1515_v31 = vperm.slane %v1507_v21, %v1329_v35  ;;  %v1658_v16 = vld [vmem:[%s2406_s12 + $0x28] sm:$0xff]  ;;  %v1657_v21 = vld [vmem:[%s2406_s12 + $0x20] sm:$0xff] }
 0x696   : > { %v1505_v32 = vsel %vm1299_vm9, %v1504_v30, %v1485_v19  ;;  %v1518_v33 = vrot.slane %v1499_v29, 4  ;;  %v1902_v19 = vld [vmem:[%s2403_s9] ss:$0 sm:$0xff]  ;;  %1677 = vmatpush.msra.mxu0 %v1664_v18  ;;  %v1654_v30 = vld [vmem:[%s2406_s12 + $0x8] sm:$0xff] }
 0x697   : > { %v1523_v34 = vsel %vm1299_vm9, %v1515_v31, %v1522_v28  ;;  %v1520_v36 = vrot.slane %v1515_v31, 4  ;;  %v1511_v37 = vperm.slane %v1505_v32, %v1329_v35  ;;  %v1543_v35 = vld [vmem:[%s2400_s6 + $0x10] sm:$0xff]  ;;  %v1656_v28 = vld [vmem:[%s2406_s12 + $0x18] sm:$0xff]  ;;  %v1653_v31 = vld [vmem:[%s2406_s12] sm:$0xff] }
 0x698   : > { %1533 = vrot.lane.b32.xlu1 %v1523_v34, %s2017_s18  ;;  %1566 = vmatpush.msrb.mxu2 %v1543_v35  ;;  %v1903_v32 = vld [vmem:[%s2405_s11] ss:$0 sm:$0xff] }
 0x699   : > { %v1521_v27 = vsel %vm1299_vm9, %v1520_v36, %v1503_v26  ;;  %v1516_v38 = vrot.slane %v1511_v37, 4  ;;  %v1519_v39 = vsel %vm1299_vm9, %v1511_v37, %v1518_v33  ;;  %1678 = vmatpush.msra.mxu0 %v1663_v14  ;;  %v1659_v26 = vld [vmem:[%s2406_s12 + $0x30] sm:$0xff] }
 0x69a   : > { %1529 = vrot.lane.b32.xlu2 %v1521_v27, %s2018_s30  ;;  %1525 = vrot.lane.b32.xlu0 %v1519_v39, %s2019_s28  ;;  %s1798_s30 = sshll.u32 %s535_s1, 3  ;;  %s1816_s28 = sshll.u32 %s1999_s24, 3 }
 0x69b   : > { %v1517_v40 = vsel %vm1299_vm9, %v1516_v38, %v1499_v29  ;;  %1567 = vmatpush.msrb.mxu2 %v1542_v42  ;;  %1679 = vmatpush.msra.mxu0 %v1662_v23  ;;  %v1655_v29 = vld [vmem:[%s2406_s12 + $0x10] sm:$0xff]  ;;  %s1707_s20 = scalar_lea.hbm %s2410_s16, %s1816_s28  ;;  %s537_s14 = scalar_lea.vmem [#allocation5], %s1798_s30 }
 0x69c   : > { %s1709_s18 = sshll.u32 %s537_s14, 4  ;;  %s1711_s2 = sshll.u32 %s1707_s20, 4  ;;  %s1710_s18 = int_to_ptr.vmem [resolvable:$true] %s1709_s18  ;;  %s1712_s2 = int_to_ptr.hbm [resolvable:$true] %s1711_s2 }
 0x69d   : > { %1568 = vmatpush.msrb.mxu2 %v1541_v43  ;;  %1680 = vmatpush.msra.mxu0 %v1661_v24  ;;  %v1904_v43 = vld [vmem:[%s2407_s13] ss:$0 sm:$0xff]  ;;  %s1696_s24 = scalar_lea.sflag [#allocation6], %s535_s1  ;;  %s1943_s3 = sshra.s32 %s1712_s2, 4  ;;  %s1944_s3 = int_to_ptr.hbm [resolvable:$true] %s1943_s3 }
 0x69e   : > { %s1945_s25 = scalar_lea.hbm %s1944_s3, 8  ;;  %s1949_s30 = scalar_lea.hbm %s2410_s16, 16 }
 0x69f   : > { %1681 = vmatpush.msra.mxu0 %v1660_v25  ;;  %p1946_p12 = scmp.ne.s32.totalorder %s1944_s3, %s1945_s25  ;;  %p1950_p1 = scmp.lt.s32.totalorder %s1944_s3, %s2410_s16 }
 0x6a0   : > { %p1951_p2 = scmp.lt.s32.totalorder %s1949_s30, %s1945_s25 }
 0x6a1   : > { %1682 = vmatpush.msra.mxu0 %v1659_v26  ;;  %p1947_p13 = pnand %p1946_p12, %p2145_p4 }
 0x6a2   : > { %p1952_p3 = por %p1951_p2, %p1950_p1 }
 0x6a3   : > { %1683 = vmatpush.msra.mxu0 %v1658_v16  ;;  %p1948_p0 = pneg %p1947_p13 }
 0x6a5   : > { %1684 = vmatpush.msra.mxu0 %v1657_v21  ;;  %p1953_p5 = pnand %p1952_p3, %p1948_p0 }
 0x6a7   : > { %1685 = vmatpush.msra.mxu0 %v1656_v28 }
 0x6a9   : > { %1686 = vmatpush.msra.mxu0 %v1655_v29 }
 0x6ab   : > { %1687 = vmatpush.msra.mxu0 %v1654_v30 }
 0x6ad   : > { %1688 = vmatpush.msra.mxu0 %v1653_v31 }
 0x6f4   : > { %v1530_v45 = vpop.permute.xlu2 %1529 }
 0x70a   : > { %v1534_v47 = vpop.permute.xlu1 %1533 }
 0x70c   : > { %v1526_v44 = vpop.permute.xlu0 %1525 }
 0x70d   : > { %v1536_v46 = vsel %vm797_vm5, %v1517_v40, %v1526_v44 }
 0x70e   : > { %v1538_v48 = vsel %vm1537_vm10, %v1536_v46, %v1530_v45 }
 0x70f   : > { %v1540_v49 = vsel %vm1539_vm11, %v1538_v48, %v1534_v47 }
 0x710   : > { %1813 = vmatmul.msk.f32.vlgmr.msrb.gmra.mxu2 %vm553_vm0, %v1540_v49 }
 0x793   : > { %v1570_v51 = vpop.f32.mrf.mxu2 }
 0x794   : > { %v1571_v52 = vadd.f32 %v1900_v50, %v1570_v51 }
 0x796   : > { %v2274_v53 = vadd.f32 %v1571_v52, %v2172_v0  ;;  %v1615_v0 = vld [vmem:[%s2404_s10 + $0x10] sm:$0xff] }
 0x797   : > { %1637 = vmatpush.msra.mxu3 %v1615_v0 }
 0x798   : > { %v1576_v54 = vsel %vm553_vm0, %v2274_v53, 0.0 }
 0x799   : > { %1577 = vadd.xlane.f32.xlu1 %v1576_v54  ;;  %1638 = vmatpush.msra.mxu3 %v1614_v61 }
 0x79b   : > { %1639 = vmatpush.msra.mxu3 %v1613_v62 }
 0x80c   : > { %v1578_v55 = vpop.xlane.xlu1 %1577 }
 0x80d   : > { %v1586_v56 = vmul.f32 %v1578_v55, %v2176_v8 }
 0x80f   : > { %v1587_v57 = vsub.f32 %v2274_v53, %v1586_v56 }
 0x811   : > { %v1588_v58 = vmul.f32 %v1587_v57, %v1587_v57 }
 0x813   : > { %v1589_v59 = vsel %vm553_vm0, %v1588_v58, 0.0 }
 0x814   : > { %1590 = vadd.xlane.f32.xlu1 %v1589_v59 }
 0x887   : > { %v1591_v3 = vpop.xlane.xlu1 %1590 }
 0x888   : > { %v1592_v4 = vmul.f32 %v1591_v3, %v2176_v8  ;;  %v1901_v8 = vld [vmem:[%s2402_s8] ss:$0 sm:$0xff] }
 0x88a   : > { %v1593_v6 = vadd.f32 1e-05, %v1592_v4 }
 0x88c   : > { %1925 = vrsqrt.f32 %v1593_v6  ;;  %vm1600_vm13 = vweird.f32 %v1593_v6 }
 0x892   : > { %v1926_v7 = vpop.eup %1925 }
 0x893   : > { %v1595_v9 = vmul.f32 %v1926_v7, %v1593_v6  ;;  %vm1601_vm12 = vweird.f32 %v1926_v7 }
 0x894   : > { %vm1602_vm14 = vmor %vm1600_vm13, %vm1601_vm12 }
 0x895   : > { %v1596_v10 = vmul.f32 %v1926_v7, %v1595_v9 }
 0x897   : > { %v1597_v11 = vmul.f32 0.5, %v1596_v10 }
 0x899   : > { %v1598_v12 = vsub.f32 1.5, %v1597_v11 }
 0x89b   : > { %v1599_v13 = vmul.f32 %v1926_v7, %v1598_v12 }
 0x89d   : > { %v1603_v15 = vsel %vm1602_vm14, %v1926_v7, %v1599_v13 }
 0x89e   : > { %v1604_v17 = vmul.f32 %v1603_v15, %v1587_v57 }
 0x8a0   : > { %v1608_v20 = vmul.f32 %v1901_v8, %v1604_v17 }
 0x8a2   : > { %v1612_v22 = vadd.f32 %v1902_v19, %v1608_v20 }
 0x8a4   : > { %1814 = vmatmul.msk.f32.vlgmr.msra.gmra.mxu3 %vm553_vm0, %v1612_v22 }
 0x927   : > { %v1641_v33 = vpop.f32.mrf.mxu3 }
 0x928   : > { %v1642_v34 = vadd.f32 %v1903_v32, %v1641_v33 }
 0x92a   : > { %v1645_v36 = vmul.f32 0.044715, %v1642_v34  ;;  %v1644_v41 = vmul.f32 0.5, %v1642_v34 }
 0x92c   : > { %v1646_v37 = vmul.f32 %v1645_v36, %v1642_v34 }
 0x92e   : > { %v1647_v27 = vmul.f32 %v1646_v37, %v1642_v34 }
 0x930   : > { %v1648_v38 = vadd.f32 %v1647_v27, %v1642_v34 }
 0x932   : > { %v1649_v39 = vmul.f32 0.7978846, %v1648_v38 }
 0x934   : > { %1927 = vtanh.f32 %v1649_v39 }
 0x93a   : > { %v1928_v40 = vpop.eup %1927 }
 0x93b   : > { %v1651_v35 = vadd.f32 1.0, %v1928_v40 }
 0x93d   : > { %v1652_v42 = vmul.f32 %v1651_v35, %v1644_v41 }
 0x93f   : > { %1689 = vmatmul.f32.vlgmr.msra.gmra.mxu0 %v1652_v42 }
 0x9bc   : > { %v1690_v44 = vpop.f32.mrf.mxu0 }
 0x9bd   : > { %v1691_v45 = vadd.f32 %v1904_v43, %v1690_v44 }
 0x9bf   : > { %v1693_v46 = vadd.f32 %v1691_v45, %v2274_v53 }
 0x9c1   : > { %1694 = vst.msk [vmem:[%s537_s14] sm:$0xff] %vm553_vm0, %v1693_v46 }
 0x9c2   : > { %1956 = shalt.err (!%p1953_p5)
}
 0x9c3   : > { %1819 = dma.vmem_to_hbm [thread:$0]  (%p2145_p4), %s1710_s18, 128, %s1712_s2, %s1696_s24  }
 0x9c4 PF: > { %p1825_p6 = scmp.ge.s32.totalorder %s2007_s26, 2  ;;  %s1723_s1 = sand.u32 1, %s1987_s21  }
 0x9c5   : > { %s1724_s20 = scalar_lea.sflag [#allocation6], %s1723_s1 }
 0x9c6   : > { %p1822_p7 = pnand %p1825_p6, %p2152_p8 }
 0x9c8   : > { %p1823_p9 = pneg %p1822_p7 }
 0x9ca   : > { %1982 = dma.done.wait (%p1823_p9), %s1724_s20, 128  }
 0x9cb   : > { %1984 = vsyncadd (%p1823_p9), %s1724_s20, 4294967168  ;;  %s29_s26 = sadd.s32 1, %s2007_s26   ;;  %s2426_s24 = sld [smem:[#allocation8_spill]] }
 0x9cc   : > { %p26_p10 = scmp.ge.s32.totalorder %s29_s26, 4   ;;  %s2427_s25 = sld [smem:[#allocation9_spill]] }
 0x9cd   : > { %s2428_s21 = smov %s1991_s22  ;;  %s2429_s22 = smov %s1995_s23 }
 0x9ce   : > { %s2430_s23 = smov %s2158_s17  ;;  %28 = sbr.rel (!%p26_p10) target bundleno = 9 (0x9), region = 128 }
 0x9d3   :  { %1730 = vsyncpa [#allocation6], 1 }
 0x9d4   :  { %1732 = vsyncpa [#allocation6 + $0x1], 1 }

</bundles_post_ra>
